<compile_context>
chip_gen: v7x
topology: tpu7x:2x2x1
jax: 0.10.0
libtpu: 0.0.40
codegen_flags: <defaults>
</compile_context>

<pallas_src>
import jax
import jax.numpy as jnp
from jax.experimental import pallas as pl
from jax.experimental.pallas import tpu as pltpu


def _round_up(x, m):
    return ((x + m - 1) // m) * m


def _patch_embed_kernel(x_ref, w_ref, b_ref, o_ref):
    # x_ref: (TM, K) patches, w_ref: (K, E) weight, b_ref: (1, E) f32 bias,
    # o_ref: (TM, E) output. bf16 (or f32) in, f32 MXU accumulate, cast once.
    acc = jnp.dot(x_ref[...], w_ref[...], preferred_element_type=jnp.float32)
    o_ref[...] = (acc + b_ref[...]).astype(o_ref.dtype)


def patch_embedding(x, weight, bias, patch_size, *, compute_dtype=jnp.bfloat16):
    """x: (B, C, H, W) NCHW; weight: (E, C, p, p); bias: (E,). Returns (B, HW/p^2, E)."""
    B, C, H, W = x.shape
    p = patch_size
    assert H % p == 0 and W % p == 0, "image size must be divisible by patch size"
    hp, wp = H // p, W // p
    E = weight.shape[0]
    K = C * p * p
    M = B * hp * wp
    out_dtype = x.dtype

    # Patchify: per-patch element order (C, ph, pw) matches weight.reshape(E, C*p*p).
    # The transpose is eligible for fusion into the pallas_call input DMA
    # (allow_input_fusion below) so it need not be materialized in HBM.
    x_patches = (
        x.reshape(B, C, hp, p, wp, p)
        .transpose(0, 2, 4, 1, 3, 5)  # (B, hp, wp, C, p, p)
        .reshape(M, K)
        .astype(compute_dtype)
    )
    w_mat = weight.reshape(E, K).T.astype(compute_dtype)  # (K, E), cast once
    b_mat = bias.astype(jnp.float32).reshape(1, E)        # f32, no in-kernel cast

    # Lane-dense padding: K, E to multiples of 128. Tile M at up to 512 rows
    # (256-aligned for the 2x256 MXU on v6e/v7x; fits v7x's 64 MiB VMEM budget).
    K_pad = _round_up(K, 128)
    E_pad = _round_up(E, 128)
    TM = min(512, _round_up(M, 256))
    M_pad = _round_up(M, TM)

    if K_pad != K:
        x_patches = jnp.pad(x_patches, ((0, 0), (0, K_pad - K)))
        w_mat = jnp.pad(w_mat, ((0, K_pad - K), (0, 0)))
    if E_pad != E:
        w_mat = jnp.pad(w_mat, ((0, 0), (0, E_pad - E)))
        b_mat = jnp.pad(b_mat, ((0, 0), (0, E_pad - E)))
    if M_pad != M:
        x_patches = jnp.pad(x_patches, ((0, M_pad - M), (0, 0)))

    in_bytes = jnp.dtype(compute_dtype).itemsize
    out_bytes = jnp.dtype(out_dtype).itemsize

    out = pl.pallas_call(
        _patch_embed_kernel,
        out_shape=jax.ShapeDtypeStruct((M_pad, E_pad), out_dtype),
        grid=(M_pad // TM,),
        in_specs=[
            pl.BlockSpec((TM, K_pad), lambda i: (i, 0)),      # streamed patch tiles
            pl.BlockSpec((K_pad, E_pad), lambda i: (0, 0)),   # weight stays resident
            pl.BlockSpec((1, E_pad), lambda i: (0, 0)),       # bias stays resident
        ],
        out_specs=pl.BlockSpec((TM, E_pad), lambda i: (i, 0)),
        compiler_params=pltpu.CompilerParams(
            dimension_semantics=("parallel",),          # megacore-shard M on v7x
            allow_input_fusion=[True, False, False],    # fuse patchify into input DMA
        ),
        cost_estimate=pl.CostEstimate(
            flops=2 * M_pad * K_pad * E_pad,
            transcendentals=0,
            bytes_accessed=(M_pad * K_pad + K_pad * E_pad) * in_bytes
            + M_pad * E_pad * out_bytes,
        ),
    )(x_patches, w_mat, b_mat)

    return out[:M, :E].reshape(B, hp * wp, E)


def _reference_conv_patch_embed(x, weight, bias, patch_size):
    """Pure-JAX reference: NCHW conv with stride=kernel=patch, then flatten+permute."""
    y = jax.lax.conv_general_dilated(
        x.astype(jnp.float32),
        weight.astype(jnp.float32),
        window_strides=(patch_size, patch_size),
        padding="VALID",
        dimension_numbers=("NCHW", "OIHW", "NCHW"),
    )
    y = y + bias.astype(jnp.float32)[None, :, None, None]
    B, E, hp, wp = y.shape
    return y.reshape(B, E, hp * wp).transpose(0, 2, 1)


if __name__ == "__main__":
    # Small shapes consistent with the module's forward.
    B, C, H, W = 2, 4, 16, 16
    patch_size = 4
    embedding_dim = 32

    key = jax.random.PRNGKey(0)
    kx, kw, kb = jax.random.split(key, 3)

    x = jax.random.normal(kx, (B, C, H, W), dtype=jnp.float32)
    # Deterministic parameter init (Conv2d weight shape (E, C, p, p), bias (E,)).
    fan_in = C * patch_size * patch_size
    bound = 1.0 / (fan_in ** 0.5)
    weight = jax.random.uniform(
        kw, (embedding_dim, C, patch_size, patch_size),
        minval=-bound, maxval=bound, dtype=jnp.float32)
    bias = jax.random.uniform(
        kb, (embedding_dim,), minval=-bound, maxval=bound, dtype=jnp.float32)

    ref = _reference_conv_patch_embed(x, weight, bias, patch_size)
    n_patches = (H // patch_size) * (W // patch_size)

    # Full-precision path: exact check of the kernel math / tiling / padding.
    out_f32 = patch_embedding(x, weight, bias, patch_size, compute_dtype=jnp.float32)
    out_f32 = jax.block_until_ready(out_f32)
    assert out_f32.shape == (B, n_patches, embedding_dim)
    assert jnp.allclose(out_f32, ref, atol=1e-4, rtol=1e-4), "f32 mismatch vs reference conv"

    # Default bf16-fed MXU path (f32 accumulate): loose tolerance.
    out_bf16 = patch_embedding(x, weight, bias, patch_size)
    out_bf16 = jax.block_until_ready(out_bf16)
    assert out_bf16.shape == (B, n_patches, embedding_dim)
    assert jnp.allclose(out_bf16, ref, atol=3e-2, rtol=3e-2), "bf16 mismatch vs reference conv"

    print("KERNEL_OK")
</pallas_src>

<mosaic_0001>
module attributes {stable_mosaic.version = 11 : i64} {
  func.func @_patch_embed_kernel(%arg0: i32, %arg1: memref<256x128xf32, #tpu.memory_space<vmem>>, %arg2: memref<128x128xf32, #tpu.memory_space<vmem>>, %arg3: memref<1x128xf32, #tpu.memory_space<vmem>>, %arg4: memref<256x128xf32, #tpu.memory_space<vmem>>) attributes {dimension_semantics = [#tpu.dimension_semantics<parallel>], iteration_bounds = array<i64: 1>, scalar_prefetch = 0 : i64, scratch_operands = 0 : i64, tpu.core_type = #tpu.core_type<tc>, window_params = [{transform_indices = @transform_0, window_bounds = array<i64: 256, 128>}, {pipeline_mode = #tpu.pipeline_mode<synchronous>, transform_indices = @transform_1, window_bounds = array<i64: 128, 128>}, {pipeline_mode = #tpu.pipeline_mode<synchronous>, transform_indices = @transform_2, window_bounds = array<i64: 1, 128>}, {transform_indices = @transform_3, window_bounds = array<i64: 256, 128>}]} {
    %c0 = arith.constant 0 : index
    %c0_0 = arith.constant 0 : index
    %0 = vector.load %arg1[%c0, %c0_0] : memref<256x128xf32, #tpu.memory_space<vmem>>, vector<256x128xf32>
    %c0_1 = arith.constant 0 : index
    %c0_2 = arith.constant 0 : index
    %1 = vector.load %arg2[%c0_1, %c0_2] : memref<128x128xf32, #tpu.memory_space<vmem>>, vector<128x128xf32>
    %cst = arith.constant dense<0.000000e+00> : vector<256x128xf32>
    %2 = tpu.matmul %0, %1, %cst {dimension_numbers = #tpu.dot_dimension_numbers<[1], [0], [0], [1], [0, 0, 1, 1], [], []>} : vector<256x128xf32>, vector<128x128xf32>, vector<256x128xf32> -> vector<256x128xf32>
    %c0_3 = arith.constant 0 : index
    %c0_4 = arith.constant 0 : index
    %3 = vector.load %arg3[%c0_3, %c0_4] : memref<1x128xf32, #tpu.memory_space<vmem>>, vector<1x128xf32>
    %4 = vector.broadcast %3 : vector<1x128xf32> to vector<256x128xf32>
    %5 = arith.addf %2, %4 : vector<256x128xf32>
    %c0_5 = arith.constant 0 : index
    %c0_6 = arith.constant 0 : index
    %6 = vector.load %arg4[%c0_5, %c0_6] : memref<256x128xf32, #tpu.memory_space<vmem>>, vector<256x128xf32>
    tpu.vector_store %arg4[%c0_5, %c0_6], %5 {strides = array<i32>} : memref<256x128xf32, #tpu.memory_space<vmem>>, vector<256x128xf32>,
    return
  }
  func.func @transform_0(%arg0: i32) -> (i32, i32) {
    %c0_i32 = arith.constant 0 : i32
    %c0_i32_0 = arith.constant 0 : i32
    return %arg0, %c0_i32 : i32, i32
  }
  func.func @transform_1(%arg0: i32) -> (i32, i32) {
    %c0_i32 = arith.constant 0 : i32
    %c0_i32_0 = arith.constant 0 : i32
    %c0_i32_1 = arith.constant 0 : i32
    return %c0_i32, %c0_i32_0 : i32, i32
  }
  func.func @transform_2(%arg0: i32) -> (i32, i32) {
    %c0_i32 = arith.constant 0 : i32
    %c0_i32_0 = arith.constant 0 : i32
    %c0_i32_1 = arith.constant 0 : i32
    return %c0_i32, %c0_i32_0 : i32, i32
  }
  func.func @transform_3(%arg0: i32) -> (i32, i32) {
    %c0_i32 = arith.constant 0 : i32
    %c0_i32_0 = arith.constant 0 : i32
    return %arg0, %c0_i32 : i32, i32
  }
}

</mosaic_0001>

<bundles_post_ra>
// kernel: tpu_custom_call.1
= control target key start
LH: loop header
LB: loop body
LE: loop exit
PB: predicated region body
PF: predicated region fallthrough
CT: control target
= control target key end

     0   :  { %8 = vsyncpa [#allocation3], 0  ;;  %s734_s0 = inlined_call_operand.hbm [shape: f32[256,128], index: 0, kind: input, shape index: {}]   ;;  %s735_s1 = inlined_call_operand.hbm [shape: f32[128,128], index: 1, kind: input, shape index: {}]   ;;  %s736_s2 = inlined_call_operand.vmem [shape: f32[1,128], index: 2, kind: input, shape index: {}]   ;;  %s737_s3 = inlined_call_operand.hbm [shape: f32[256,128], index: 3, kind: output, shape index: {}]  }
   0x1   :  { %9 = vsyncpa [#allocation6], 0 }
   0x2   :  { %10 = vsyncpa [#allocation4], 0  ;;  %s627_s12 = smov [#allocation2]   ;;  %s555_s16 = scalar_lea.hbm %s734_s0, 4096 }
   0x3   :  { %s16_s13 = sshll.u32 %s627_s12, 4  ;;  %p556_p0 = scmp.ne.s32.totalorder %s734_s0, %s555_s16  ;;  %s17_s13 = int_to_ptr.vmem [resolvable:$true] %s16_s13 }
   0x4   :  { %p559_p1 = scmp.lt.u32.totalorder %s555_s16, %s734_s0 }
   0x6   :  { %p561_p2 = pnand %p559_p1, %p556_p0 }
   0x8   :  { %564 = shalt.err (!%p561_p2)
}
   0x9   :  { %s565_s21 = scalar_lea.vmem %s17_s13, 4096  ;;  %p570_p4 = scmp.lt.s32.totalorder %s17_s13, %s17_s13 }
   0xa   :  { %p566_p3 = scmp.ne.s32.totalorder %s17_s13, %s565_s21  ;;  %p571_p5 = scmp.lt.s32.totalorder %s565_s21, %s565_s21 }
   0xc   :  { %p572_p6 = por %p571_p5, %p570_p4 }
   0xe   :  { %p573_p7 = pnand %p572_p6, %p566_p3 }
  0x10   :  { %576 = shalt.err (!%p573_p7)
}
  0x11   :  { %s628_s22 = smov 128   ;;  %s629_s23 = smov 8  }
  0x12   :  { %22 = dma.hbm_to_vmem [thread:$0]  %s734_s0, 4096, %s17_s13, [#allocation3], %s628_s22, %s628_s22, %s629_s23  }
  0x13   :  { %s630_s26 = smov [#allocation5]   ;;  %s577_s30 = scalar_lea.hbm %s735_s1, 2048 }
  0x14   :  { %s28_s27 = sshll.u32 %s630_s26, 4  ;;  %p578_p8 = scmp.ne.s32.totalorder %s735_s1, %s577_s30  ;;  %s29_s27 = int_to_ptr.vmem [resolvable:$true] %s28_s27 }
  0x15   :  { %p581_p9 = scmp.lt.u32.totalorder %s577_s30, %s735_s1 }
  0x17   :  { %p583_p10 = pnand %p581_p9, %p578_p8 }
  0x19   :  { %586 = shalt.err (!%p583_p10)
}
  0x1a   :  { %s587_s8 = scalar_lea.vmem %s29_s27, 2048  ;;  %p592_p12 = scmp.lt.s32.totalorder %s29_s27, %s29_s27 }
  0x1b   :  { %p588_p11 = scmp.ne.s32.totalorder %s29_s27, %s587_s8  ;;  %p593_p13 = scmp.lt.s32.totalorder %s587_s8, %s587_s8 }
  0x1d   :  { %p594_p0 = por %p593_p13, %p592_p12 }
  0x1f   :  { %p595_p1 = pnand %p594_p0, %p588_p11 }
  0x21   :  { %598 = shalt.err (!%p595_p1)
}
  0x22   :  { %34 = dma.hbm_to_vmem [thread:$0]  %s735_s1, 2048, %s29_s27, [#allocation6], %s628_s22, %s628_s22, %s629_s23  }
  0x23   :  { %621 = dma.done.wait [#allocation3], 4096  }
  0x24   :  { %622 = vsyncadd [#allocation3], 4294963200 }
  0x25   :  { %623 = dma.done.wait [#allocation6], 2048  }
  0x26   :  { %624 = vsyncadd [#allocation6], 4294965248  ;;  %v75_v0 = vld [vmem:[#allocation5] sm:$0xff]  ;;  %v76_v1 = vld [vmem:[#allocation5 + $0x8] sm:$0xff] }
  0x27   :  { %v77_v2 = vld [vmem:[#allocation5 + $0x10] sm:$0xff]  ;;  %v502_v3 = vpack.c.bf16 %v76_v1, %v75_v0  ;;  %v78_v4 = vld [vmem:[#allocation5 + $0x18] sm:$0xff]  ;;  %v79_v6 = vld [vmem:[#allocation5 + $0x20] sm:$0xff] }
  0x28   :  { %v506_v5 = vpack.c.bf16 %v78_v4, %v77_v2  ;;  %v80_v7 = vld [vmem:[#allocation5 + $0x28] sm:$0xff]  ;;  %v43_v9 = vld [vmem:[#allocation2] sm:$0xff]  ;;  %v81_v11 = vld [vmem:[#allocation5 + $0x30] sm:$0xff] }
  0x29   :  { %503 = vmatprep.subr.bf16.mxu0 %v502_v3  ;;  %534 = vmatprep.subr.bf16.mxu1 %v502_v3  ;;  %v510_v8 = vpack.c.bf16 %v80_v7, %v79_v6  ;;  %v59_v10 = vld [vmem:[#allocation2 + $0x80] sm:$0xff]  ;;  %v82_v12 = vld [vmem:[#allocation5 + $0x38] sm:$0xff]  ;;  %v84_v15 = vld [vmem:[#allocation5 + $0x48] sm:$0xff] }
  0x2a   :  { %505 = vmatpush3.bf16.msra.mxu0 %v502_v3  ;;  %542 = vmatpush3.bf16.msra.mxu1 %v502_v3  ;;  %v514_v13 = vpack.c.bf16 %v82_v12, %v81_v11  ;;  %v83_v14 = vld [vmem:[#allocation5 + $0x40] sm:$0xff]  ;;  %v85_v17 = vld [vmem:[#allocation5 + $0x50] sm:$0xff]  ;;  %v86_v18 = vld [vmem:[#allocation5 + $0x58] sm:$0xff] }
  0x2b   :  { %507 = vmatprep.subr.bf16.mxu0 %v506_v5  ;;  %535 = vmatprep.subr.bf16.mxu1 %v506_v5  ;;  %v518_v16 = vpack.c.bf16 %v84_v15, %v83_v14  ;;  %v522_v19 = vpack.c.bf16 %v86_v18, %v85_v17  ;;  %v87_v20 = vld [vmem:[#allocation5 + $0x60] sm:$0xff]  ;;  %v88_v21 = vld [vmem:[#allocation5 + $0x68] sm:$0xff]  ;;  %v89_v23 = vld [vmem:[#allocation5 + $0x70] sm:$0xff] }
  0x2c   :  { %454 = vmatprep.mubr.f32.mxu0 %v43_v9  ;;  %478 = vmatprep.mubr.f32.mxu1 %v59_v10  ;;  %v526_v22 = vpack.c.bf16 %v88_v21, %v87_v20  ;;  %v90_v24 = vld [vmem:[#allocation5 + $0x78] sm:$0xff]  ;;  %v44_v26 = vld [vmem:[#allocation2 + $0x8] sm:$0xff]  ;;  %v45_v28 = vld [vmem:[#allocation2 + $0x10] sm:$0xff] }
  0x2d   :  { %v530_v25 = vpack.c.bf16 %v90_v24, %v89_v23  ;;  %v60_v27 = vld [vmem:[#allocation2 + $0x88] sm:$0xff]  ;;  %v61_v29 = vld [vmem:[#allocation2 + $0x90] sm:$0xff]  ;;  %v46_v30 = vld [vmem:[#allocation2 + $0x18] sm:$0xff] }
  0x2e   :  { %509 = vmatpush3.bf16.msra.mxu0 %v506_v5  ;;  %543 = vmatpush3.bf16.msra.mxu1 %v506_v5  ;;  %v62_v31 = vld [vmem:[#allocation2 + $0x98] sm:$0xff]  ;;  %v47_v32 = vld [vmem:[#allocation2 + $0x20] sm:$0xff]  ;;  %v48_v34 = vld [vmem:[#allocation2 + $0x28] sm:$0xff] }
  0x2f   :  { %511 = vmatprep.subr.bf16.mxu0 %v510_v8  ;;  %536 = vmatprep.subr.bf16.mxu1 %v510_v8  ;;  %v63_v33 = vld [vmem:[#allocation2 + $0xa0] sm:$0xff]  ;;  %v64_v35 = vld [vmem:[#allocation2 + $0xa8] sm:$0xff]  ;;  %v49_v36 = vld [vmem:[#allocation2 + $0x30] sm:$0xff] }
  0x30   :  { %v65_v37 = vld [vmem:[#allocation2 + $0xb0] sm:$0xff]  ;;  %v50_v38 = vld [vmem:[#allocation2 + $0x38] sm:$0xff]  ;;  %v51_v40 = vld [vmem:[#allocation2 + $0x40] sm:$0xff] }
  0x31   :  { %v66_v39 = vld [vmem:[#allocation2 + $0xb8] sm:$0xff]  ;;  %v67_v41 = vld [vmem:[#allocation2 + $0xc0] sm:$0xff]  ;;  %v52_v42 = vld [vmem:[#allocation2 + $0x48] sm:$0xff] }
  0x32   :  { %513 = vmatpush3.bf16.msra.mxu0 %v510_v8  ;;  %544 = vmatpush3.bf16.msra.mxu1 %v510_v8  ;;  %v68_v43 = vld [vmem:[#allocation2 + $0xc8] sm:$0xff]  ;;  %v53_v44 = vld [vmem:[#allocation2 + $0x50] sm:$0xff]  ;;  %v54_v46 = vld [vmem:[#allocation2 + $0x58] sm:$0xff] }
  0x33   :  { %515 = vmatprep.subr.bf16.mxu0 %v514_v13  ;;  %537 = vmatprep.subr.bf16.mxu1 %v514_v13  ;;  %v69_v45 = vld [vmem:[#allocation2 + $0xd0] sm:$0xff]  ;;  %v70_v47 = vld [vmem:[#allocation2 + $0xd8] sm:$0xff]  ;;  %v55_v48 = vld [vmem:[#allocation2 + $0x60] sm:$0xff] }
  0x34   :  { %v71_v49 = vld [vmem:[#allocation2 + $0xe0] sm:$0xff]  ;;  %v56_v50 = vld [vmem:[#allocation2 + $0x68] sm:$0xff]  ;;  %v57_v52 = vld [vmem:[#allocation2 + $0x70] sm:$0xff] }
  0x35   :  { %v72_v51 = vld [vmem:[#allocation2 + $0xe8] sm:$0xff]  ;;  %v73_v53 = vld [vmem:[#allocation2 + $0xf0] sm:$0xff]  ;;  %v58_v54 = vld [vmem:[#allocation2 + $0x78] sm:$0xff] }
  0x36   :  { %517 = vmatpush3.bf16.msra.mxu0 %v514_v13  ;;  %545 = vmatpush3.bf16.msra.mxu1 %v514_v13  ;;  %v74_v55 = vld [vmem:[#allocation2 + $0xf8] sm:$0xff]  ;;  %v685_v56 = vld [vmem:[%s736_s2] ss:$0 sm:$0xff]  ;;  %s631_s2 = smov [#allocation7]  }
  0x37   :  { %519 = vmatprep.subr.bf16.mxu0 %v518_v16  ;;  %538 = vmatprep.subr.bf16.mxu1 %v518_v16  ;;  %s360_s11 = sshll.u32 %s631_s2, 4  ;;  %s361_s11 = int_to_ptr.vmem [resolvable:$true] %s360_s11 }
  0x38   :  { %s599_s12 = scalar_lea.vmem %s361_s11, 4096  ;;  %p604_p3 = scmp.lt.s32.totalorder %s361_s11, %s361_s11 }
  0x39   :  { %p600_p2 = scmp.ne.s32.totalorder %s361_s11, %s599_s12  ;;  %p605_p4 = scmp.lt.s32.totalorder %s599_s12, %s599_s12 }
  0x3a   :  { %521 = vmatpush3.bf16.msra.mxu0 %v518_v16  ;;  %546 = vmatpush3.bf16.msra.mxu1 %v518_v16 }
  0x3b   :  { %523 = vmatprep.subr.bf16.mxu0 %v522_v19  ;;  %539 = vmatprep.subr.bf16.mxu1 %v522_v19  ;;  %p606_p5 = por %p605_p4, %p604_p3 }
  0x3d   :  { %p607_p6 = pnand %p606_p5, %p600_p2 }
  0x3e   :  { %525 = vmatpush3.bf16.msra.mxu0 %v522_v19  ;;  %547 = vmatpush3.bf16.msra.mxu1 %v522_v19 }
  0x3f   :  { %527 = vmatprep.subr.bf16.mxu0 %v526_v22  ;;  %540 = vmatprep.subr.bf16.mxu1 %v526_v22 }
  0x42   :  { %529 = vmatpush3.bf16.msra.mxu0 %v526_v22  ;;  %548 = vmatpush3.bf16.msra.mxu1 %v526_v22 }
  0x43   :  { %531 = vmatprep.subr.bf16.mxu0 %v530_v25  ;;  %541 = vmatprep.subr.bf16.mxu1 %v530_v25 }
  0x46   :  { %533 = vmatpush3.bf16.msra.mxu0 %v530_v25  ;;  %549 = vmatpush3.bf16.msra.mxu1 %v530_v25 }
  0x49   :  { %455 = vmatmul.mubr.f32.vlgmr.msra.gmra.mrb[0].mxu0 %v44_v26  ;;  %479 = vmatmul.mubr.f32.vlgmr.msra.gmra.mrb[0].mxu1 %v60_v27 }
  0x4a   :  { %457 = vmatprep.mubr.f32.mxu0 %v45_v28  ;;  %481 = vmatprep.mubr.f32.mxu1 %v61_v29 }
  0x4d   :  { %458 = vmatmul.mubr.f32.gmra.mrb[2].mxu0 %v46_v30  ;;  %482 = vmatmul.mubr.f32.gmra.mrb[2].mxu1 %v62_v31 }
  0x4e   :  { %460 = vmatprep.mubr.f32.mxu0 %v47_v32  ;;  %484 = vmatprep.mubr.f32.mxu1 %v63_v33 }
  0x51   :  { %461 = vmatmul.mubr.f32.gmra.mrb[4].mxu0 %v48_v34  ;;  %485 = vmatmul.mubr.f32.gmra.mrb[4].mxu1 %v64_v35 }
  0x52   :  { %463 = vmatprep.mubr.f32.mxu0 %v49_v36  ;;  %487 = vmatprep.mubr.f32.mxu1 %v65_v37 }
  0x55   :  { %464 = vmatmul.mubr.f32.gmra.mrb[6].mxu0 %v50_v38  ;;  %488 = vmatmul.mubr.f32.gmra.mrb[6].mxu1 %v66_v39 }
  0x56   :  { %466 = vmatprep.mubr.f32.mxu0 %v51_v40  ;;  %490 = vmatprep.mubr.f32.mxu1 %v67_v41 }
  0x59   :  { %467 = vmatmul.mubr.f32.gmra.mrb[8].mxu0 %v52_v42  ;;  %491 = vmatmul.mubr.f32.gmra.mrb[8].mxu1 %v68_v43 }
  0x5a   :  { %469 = vmatprep.mubr.f32.mxu0 %v53_v44  ;;  %493 = vmatprep.mubr.f32.mxu1 %v69_v45 }
  0x5d   :  { %470 = vmatmul.mubr.f32.gmra.mrb[10].mxu0 %v54_v46  ;;  %494 = vmatmul.mubr.f32.gmra.mrb[10].mxu1 %v70_v47 }
  0x5e   :  { %472 = vmatprep.mubr.f32.mxu0 %v55_v48  ;;  %496 = vmatprep.mubr.f32.mxu1 %v71_v49 }
  0x61   :  { %473 = vmatmul.mubr.f32.gmra.mrb[12].mxu0 %v56_v50  ;;  %497 = vmatmul.mubr.f32.gmra.mrb[12].mxu1 %v72_v51 }
  0x62   :  { %475 = vmatprep.mubr.f32.mxu0 %v57_v52  ;;  %499 = vmatprep.mubr.f32.mxu1 %v73_v53 }
  0x65   :  { %476 = vmatmul.mubr.f32.gmra.mrb[14].mxu0 %v58_v54  ;;  %500 = vmatmul.mubr.f32.gmra.mrb[14].mxu1 %v74_v55 }
 0x11c   :  { %v456_v57 = vpop.f32.mrb[0].mxu0  ;;  %v480_v58 = vpop.f32.mrb[0].mxu1 }
 0x11d   :  { %v170_v59 = vadd.f32 %v456_v57, %v685_v56  ;;  %v250_v60 = vadd.f32 %v480_v58, %v685_v56  ;;  %v164_v61 = vpop.f32.mrb[1].mxu0  ;;  %v244_v62 = vpop.f32.mrb[1].mxu1 }
 0x11e   :  { %v165_v63 = vadd.f32 %v685_v56, %v164_v61  ;;  %v245_v0 = vadd.f32 %v685_v56, %v244_v62 }
 0x11f   :  { %324 = vst [vmem:[#allocation7 + $0x8] sm:$0xff] %v170_v59  ;;  %340 = vst [vmem:[#allocation7 + $0x88] sm:$0xff] %v250_v60 }
 0x120   :  { %323 = vst [vmem:[#allocation7] sm:$0xff] %v165_v63  ;;  %339 = vst [vmem:[#allocation7 + $0x80] sm:$0xff] %v245_v0  ;;  %v459_v1 = vpop.f32.mrb[2].mxu0  ;;  %v483_v2 = vpop.f32.mrb[2].mxu1 }
 0x121   :  { %v180_v3 = vadd.f32 %v459_v1, %v685_v56  ;;  %v260_v4 = vadd.f32 %v483_v2, %v685_v56  ;;  %v174_v5 = vpop.f32.mrb[3].mxu0  ;;  %v254_v6 = vpop.f32.mrb[3].mxu1 }
 0x122   :  { %v175_v7 = vadd.f32 %v685_v56, %v174_v5  ;;  %v255_v8 = vadd.f32 %v685_v56, %v254_v6 }
 0x123   :  { %326 = vst [vmem:[#allocation7 + $0x18] sm:$0xff] %v180_v3  ;;  %342 = vst [vmem:[#allocation7 + $0x98] sm:$0xff] %v260_v4 }
 0x124   :  { %325 = vst [vmem:[#allocation7 + $0x10] sm:$0xff] %v175_v7  ;;  %341 = vst [vmem:[#allocation7 + $0x90] sm:$0xff] %v255_v8  ;;  %v462_v9 = vpop.f32.mrb[4].mxu0  ;;  %v486_v10 = vpop.f32.mrb[4].mxu1 }
 0x125   :  { %v190_v11 = vadd.f32 %v462_v9, %v685_v56  ;;  %v270_v12 = vadd.f32 %v486_v10, %v685_v56  ;;  %v184_v13 = vpop.f32.mrb[5].mxu0  ;;  %v264_v14 = vpop.f32.mrb[5].mxu1 }
 0x126   :  { %v185_v15 = vadd.f32 %v685_v56, %v184_v13  ;;  %v265_v16 = vadd.f32 %v685_v56, %v264_v14 }
 0x127   :  { %328 = vst [vmem:[#allocation7 + $0x28] sm:$0xff] %v190_v11  ;;  %344 = vst [vmem:[#allocation7 + $0xa8] sm:$0xff] %v270_v12 }
 0x128   :  { %327 = vst [vmem:[#allocation7 + $0x20] sm:$0xff] %v185_v15  ;;  %343 = vst [vmem:[#allocation7 + $0xa0] sm:$0xff] %v265_v16  ;;  %v465_v17 = vpop.f32.mrb[6].mxu0  ;;  %v489_v18 = vpop.f32.mrb[6].mxu1 }
 0x129   :  { %v200_v19 = vadd.f32 %v465_v17, %v685_v56  ;;  %v280_v20 = vadd.f32 %v489_v18, %v685_v56  ;;  %v194_v21 = vpop.f32.mrb[7].mxu0  ;;  %v274_v22 = vpop.f32.mrb[7].mxu1 }
 0x12a   :  { %v195_v23 = vadd.f32 %v685_v56, %v194_v21  ;;  %v275_v24 = vadd.f32 %v685_v56, %v274_v22 }
 0x12b   :  { %330 = vst [vmem:[#allocation7 + $0x38] sm:$0xff] %v200_v19  ;;  %346 = vst [vmem:[#allocation7 + $0xb8] sm:$0xff] %v280_v20 }
 0x12c   :  { %329 = vst [vmem:[#allocation7 + $0x30] sm:$0xff] %v195_v23  ;;  %345 = vst [vmem:[#allocation7 + $0xb0] sm:$0xff] %v275_v24  ;;  %v468_v25 = vpop.f32.mrb[8].mxu0  ;;  %v492_v26 = vpop.f32.mrb[8].mxu1 }
 0x12d   :  { %v210_v27 = vadd.f32 %v468_v25, %v685_v56  ;;  %v290_v28 = vadd.f32 %v492_v26, %v685_v56  ;;  %v204_v29 = vpop.f32.mrb[9].mxu0  ;;  %v284_v30 = vpop.f32.mrb[9].mxu1 }
 0x12e   :  { %v205_v31 = vadd.f32 %v685_v56, %v204_v29  ;;  %v285_v32 = vadd.f32 %v685_v56, %v284_v30 }
 0x12f   :  { %332 = vst [vmem:[#allocation7 + $0x48] sm:$0xff] %v210_v27  ;;  %348 = vst [vmem:[#allocation7 + $0xc8] sm:$0xff] %v290_v28 }
 0x130   :  { %331 = vst [vmem:[#allocation7 + $0x40] sm:$0xff] %v205_v31  ;;  %347 = vst [vmem:[#allocation7 + $0xc0] sm:$0xff] %v285_v32  ;;  %v471_v33 = vpop.f32.mrb[10].mxu0  ;;  %v495_v34 = vpop.f32.mrb[10].mxu1 }
 0x131   :  { %v220_v35 = vadd.f32 %v471_v33, %v685_v56  ;;  %v300_v36 = vadd.f32 %v495_v34, %v685_v56  ;;  %v214_v37 = vpop.f32.mrb[11].mxu0  ;;  %v294_v38 = vpop.f32.mrb[11].mxu1 }
 0x132   :  { %v215_v39 = vadd.f32 %v685_v56, %v214_v37  ;;  %v295_v40 = vadd.f32 %v685_v56, %v294_v38 }
 0x133   :  { %334 = vst [vmem:[#allocation7 + $0x58] sm:$0xff] %v220_v35  ;;  %350 = vst [vmem:[#allocation7 + $0xd8] sm:$0xff] %v300_v36 }
 0x134   :  { %333 = vst [vmem:[#allocation7 + $0x50] sm:$0xff] %v215_v39  ;;  %349 = vst [vmem:[#allocation7 + $0xd0] sm:$0xff] %v295_v40  ;;  %v474_v41 = vpop.f32.mrb[12].mxu0  ;;  %v498_v42 = vpop.f32.mrb[12].mxu1 }
 0x135   :  { %v230_v43 = vadd.f32 %v474_v41, %v685_v56  ;;  %v310_v44 = vadd.f32 %v498_v42, %v685_v56  ;;  %v224_v45 = vpop.f32.mrb[13].mxu0  ;;  %v304_v46 = vpop.f32.mrb[13].mxu1 }
 0x136   :  { %v225_v47 = vadd.f32 %v685_v56, %v224_v45  ;;  %v305_v48 = vadd.f32 %v685_v56, %v304_v46 }
 0x137   :  { %336 = vst [vmem:[#allocation7 + $0x68] sm:$0xff] %v230_v43  ;;  %352 = vst [vmem:[#allocation7 + $0xe8] sm:$0xff] %v310_v44 }
 0x138   :  { %335 = vst [vmem:[#allocation7 + $0x60] sm:$0xff] %v225_v47  ;;  %351 = vst [vmem:[#allocation7 + $0xe0] sm:$0xff] %v305_v48  ;;  %v477_v49 = vpop.f32.mrb[14].mxu0  ;;  %v501_v50 = vpop.f32.mrb[14].mxu1 }
 0x139   :  { %v240_v51 = vadd.f32 %v477_v49, %v685_v56  ;;  %v320_v52 = vadd.f32 %v501_v50, %v685_v56  ;;  %v234_v53 = vpop.f32.mrb[15].mxu0  ;;  %v314_v54 = vpop.f32.mrb[15].mxu1 }
 0x13a   :  { %v235_v55 = vadd.f32 %v685_v56, %v234_v53  ;;  %v315_v57 = vadd.f32 %v685_v56, %v314_v54 }
 0x13b   :  { %338 = vst [vmem:[#allocation7 + $0x78] sm:$0xff] %v240_v51  ;;  %354 = vst [vmem:[#allocation7 + $0xf8] sm:$0xff] %v320_v52 }
 0x13c   :  { %337 = vst [vmem:[#allocation7 + $0x70] sm:$0xff] %v235_v55  ;;  %353 = vst [vmem:[#allocation7 + $0xf0] sm:$0xff] %v315_v57 }
 0x13d   :  { %610 = shalt.err (!%p607_p6)
}
 0x13e   :  { %s611_s15 = scalar_lea.hbm %s737_s3, 4096 }
 0x13f   :  { %p612_p7 = scmp.ne.s32.totalorder %s737_s3, %s611_s15  ;;  %p615_p8 = scmp.lt.u32.totalorder %s611_s15, %s737_s3 }
 0x141   :  { %p617_p9 = pnand %p615_p8, %p612_p7 }
 0x143   :  { %620 = shalt.err (!%p617_p9)
}
 0x144   :  { %366 = dma.vmem_to_hbm [thread:$0]  %s361_s11, 4096, %s737_s3, [#allocation4], %s628_s22, %s628_s22, %s629_s23  }
 0x145   :  { %625 = dma.done.wait [#allocation4], 4096  }
 0x146   :  { %626 = vsyncadd [#allocation4], 4294963200 }
 0x147   :  { %370 = vsyncpa [#allocation3], 1 }
 0x148   :  { %371 = vsyncpa [#allocation6], 1 }
 0x149   :  { %372 = vsyncpa [#allocation4], 1 }

</bundles_post_ra>
